<compile_context>
chip_gen: v6e
topology: v6e:2x2x1
jax: 0.10.0
libtpu: 0.0.40
codegen_flags: <defaults>
</compile_context>

<pallas_src>
import jax
import jax.numpy as jnp
from jax.experimental import pallas as pl
from jax.experimental.pallas import tpu as pltpu


# ----------------------------- Pallas kernel ------------------------------- #

def _sage_layers_kernel(h0_ref, a_ref, invdeg_ref, w_ref, b_ref, o_ref):
    """Grid axis 0 = layer index (sequential).

    h0_ref     : [N, D]    bf16  relu(input_transform(x)), zero-padded to D (invariant)
    a_ref      : [N, N]    bf16  adjacency message counts (exact)           (invariant)
    invdeg_ref : [N, 1]    f32   1 / max(deg, 1)                            (invariant)
    w_ref      : [2, D, D] bf16  this layer's stacked [Wl, Wr]
    b_ref      : [1, D]    f32   this layer's bias (lin_l)
    o_ref      : [N, D]    bf16  resident output block == cross-layer activation
    """
    l = pl.program_id(0)

    # Layer-0 prologue: seed the resident activation with the hoisted input
    # transform (single copy, done once).
    @pl.when(l == 0)
    def _():
        o_ref[...] = h0_ref[...]

    h = o_ref[...]                                            # bf16 [N, D]

    # Mean aggregation: exact-count matmul on the MXU (f32 acc), then an exact
    # f32 reciprocal-degree normalize on the VPU.
    agg = jnp.dot(a_ref[...], h, preferred_element_type=jnp.float32)
    agg = agg * invdeg_ref[...]                               # f32 [N, D]

    # SAGE feature transform: two independent MXU dots summed in f32
    # (replaces the [agg|h] @ [Wl;Wr] staging-buffer contraction).
    y = (jnp.dot(agg.astype(jnp.bfloat16), w_ref[0],
                 preferred_element_type=jnp.float32)
         + jnp.dot(h, w_ref[1], preferred_element_type=jnp.float32))

    # f32 epilogue: bias + ReLU (dropout = identity at inference); store bf16.
    o_ref[...] = jnp.maximum(y + b_ref[...], 0.0).astype(jnp.bfloat16)


# ------------------------------ Model wrapper ------------------------------ #

def build_graph_tensors(edge_index, num_nodes):
    """PyG-style mean aggregation (source_to_target flow): dense message-count
    matrix (duplicate edges are separate messages) + exact f32 1/deg."""
    src, dst = edge_index[0], edge_index[1]
    counts = jnp.zeros((num_nodes, num_nodes), jnp.float32).at[dst, src].add(1.0)
    deg = counts.sum(axis=1, keepdims=True)             # messages per target node
    inv_deg = 1.0 / jnp.maximum(deg, 1.0)                # isolated nodes -> 0 row anyway
    return counts, inv_deg


@jax.jit
def cocktail_gnn_forward(params, x, edge_index):
    n = x.shape[0]
    counts, inv_deg = build_graph_tensors(edge_index, n)
    a_bf = counts.astype(jnp.bfloat16)                   # small int counts: exact in bf16

    num_layers, _, d, _ = params["w_stack"].shape
    emb = params["in_w"].shape[1]

    # Hoisted input transform (K = input_dim would under-fill the MXU); pad
    # result to the uniform hidden width D (padded columns stay exactly 0).
    h0 = jnp.maximum(x @ params["in_w"] + params["in_b"], 0.0)        # f32 [N, emb]
    h0 = jnp.zeros((n, d), jnp.bfloat16).at[:, :emb].set(h0.astype(jnp.bfloat16))

    flops = num_layers * (2 * n * n * d + 4 * n * d * d)
    bytes_accessed = (n * n * 2                 # A counts (bf16)
                      + 2 * n * d * 2           # h0 in + embeddings out (bf16)
                      + n * 4                   # 1/deg (f32)
                      + num_layers * (2 * d * d * 2 + d * 4))   # weights + bias

    out = pl.pallas_call(
        _sage_layers_kernel,
        out_shape=jax.ShapeDtypeStruct((n, d), jnp.bfloat16),
        grid_spec=pltpu.PrefetchScalarGridSpec(
            num_scalar_prefetch=0,
            grid=(num_layers,),
            in_specs=[
                pl.BlockSpec((n, d), lambda l: (0, 0),
                             pipeline_mode=pl.Buffered(1)),             # h0 (invariant)
                pl.BlockSpec((n, n), lambda l: (0, 0),
                             pipeline_mode=pl.Buffered(1)),             # A counts (invariant)
                pl.BlockSpec((n, 1), lambda l: (0, 0),
                             pipeline_mode=pl.Buffered(1)),             # 1/deg (invariant)
                pl.BlockSpec((None, 2, d, d), lambda l: (l, 0, 0, 0)),  # [Wl,Wr] layer l
                pl.BlockSpec((None, 1, d), lambda l: (l, 0, 0)),        # bias layer l
            ],
            out_specs=pl.BlockSpec((n, d), lambda l: (0, 0)),           # resident activation
        ),
        compiler_params=pltpu.CompilerParams(
            dimension_semantics=("arbitrary",),          # layers are sequential
        ),
        cost_estimate=pl.CostEstimate(flops=flops, transcendentals=0,
                                      bytes_accessed=bytes_accessed),
    )(h0, a_bf, inv_deg, params["w_stack"], params["b_stack"])

    return out.astype(jnp.float32)


def init_params(key, input_dim, embedding_dim, hidden_dim, num_layers):
    """Synthetic params matching the nn.Module shapes, packed for the fused
    kernel: per-layer weights stacked as [L, 2, D, D] ([Wl, Wr], stored
    [in, out]); layer-0 weights zero-padded to the uniform hidden width."""
    assert embedding_dim <= hidden_dim
    d = hidden_dim

    key, k1, k2 = jax.random.split(key, 3)
    in_w = jax.random.normal(k1, (input_dim, embedding_dim), jnp.float32) * 0.1
    in_b = jax.random.normal(k2, (1, embedding_dim), jnp.float32) * 0.1

    dims = [embedding_dim] + [hidden_dim] * num_layers
    wl_list, wr_list, bl_list = [], [], []
    for li in range(num_layers):
        din, dout = dims[li], dims[li + 1]
        key, ka, kb, kc = jax.random.split(key, 4)
        wl_list.append(jax.random.normal(ka, (din, dout), jnp.float32) * 0.1)  # lin_l
        wr_list.append(jax.random.normal(kb, (din, dout), jnp.float32) * 0.1)  # lin_r
        bl_list.append(jax.random.normal(kc, (1, dout), jnp.float32) * 0.1)

    w_stack, b_stack = [], []
    for li in range(num_layers):
        din = dims[li]
        wl_p = jnp.zeros((d, d), jnp.float32).at[:din, :].set(wl_list[li])
        wr_p = jnp.zeros((d, d), jnp.float32).at[:din, :].set(wr_list[li])
        w_stack.append(jnp.stack([wl_p, wr_p], axis=0))   # [2, d, d]
        b_stack.append(bl_list[li])                        # [1, d]
    w_stack = jnp.stack(w_stack, axis=0)                   # [L, 2, d, d]
    b_stack = jnp.stack(b_stack, axis=0)                   # [L, 1, d]

    params = {
        "in_w": in_w,                                # f32, used by hoisted XLA prologue
        "in_b": in_b,
        "w_stack": w_stack.astype(jnp.bfloat16),
        "b_stack": b_stack,
    }
    ref_params = {"in_w": in_w, "in_b": in_b,
                  "wl": wl_list, "wr": wr_list, "bl": bl_list}
    return params, ref_params


def reference_forward(ref_params, x, a_norm):
    """Pure-JAX f32 reference of the PyTorch forward (inference mode)."""
    h = jnp.maximum(x @ ref_params["in_w"] + ref_params["in_b"], 0.0)
    for wl, wr, bl in zip(ref_params["wl"], ref_params["wr"], ref_params["bl"]):
        agg = a_norm @ h
        h = jnp.maximum(agg @ wl + h @ wr + bl, 0.0)
    return h


# ---------------------------------- Main ----------------------------------- #

if __name__ == "__main__":
    NUM_NODES = 128
    INPUT_DIM = 2
    EMBEDDING_DIM = 128   # module defaults (lane-aligned)
    HIDDEN_DIM = 256
    NUM_LAYERS = 3
    NUM_EDGES = 512

    key = jax.random.PRNGKey(0)
    key, kx, ks, kd = jax.random.split(key, 4)

    x = jax.random.normal(kx, (NUM_NODES, INPUT_DIM), jnp.float32)
    edge_index = jnp.stack([
        jax.random.randint(ks, (NUM_EDGES,), 0, NUM_NODES),   # src
        jax.random.randint(kd, (NUM_EDGES,), 0, NUM_NODES),   # dst
    ], axis=0)  # [2, E]

    params, ref_params = init_params(jax.random.PRNGKey(42), INPUT_DIM,
                                     EMBEDDING_DIM, HIDDEN_DIM, NUM_LAYERS)

    out = cocktail_gnn_forward(params, x, edge_index)
    out = jax.block_until_ready(out)
    assert out.shape == (NUM_NODES, HIDDEN_DIM), out.shape
    assert bool(jnp.all(jnp.isfinite(out)))

    # Correctness check vs. pure-JAX f32 reference (tolerance covers bf16 MXU
    # inputs and the bf16 resident activation).
    counts, inv_deg = build_graph_tensors(edge_index, NUM_NODES)
    a_norm_f32 = counts * inv_deg
    ref = reference_forward(ref_params, x, a_norm_f32)
    err = float(jnp.max(jnp.abs(out - ref)))
    scale = float(jnp.max(jnp.abs(ref))) + 1e-6
    assert err <= 0.1 * scale + 2e-2, (err, scale)

    print("KERNEL_OK")
</pallas_src>

<mosaic_0001>
module attributes {stable_mosaic.version = 11 : i64} {
  func.func private @main(%arg0: i32) attributes {dimension_semantics = [#tpu.dimension_semantics<core_parallel>], iteration_bounds = array<i64: 2>, tpu.core_type = #tpu.core_type<sc_scalar_subcore>, window_params = []} {
    return
  }
}

module attributes {stable_mosaic.version = 11 : i64} {
  func.func private @main(%arg0: i32) attributes {dimension_semantics = [#tpu.dimension_semantics<core_parallel>], iteration_bounds = array<i64: 2>, tpu.core_type = #tpu.core_type<sc_scalar_subcore>, window_params = []} {
    return
  }
}

module attributes {stable_mosaic.version = 11 : i64} {
  func.func @_sage_layers_kernel(%arg0: i32, %arg1: memref<128x256xbf16, #tpu.memory_space<vmem>>, %arg2: memref<128x128xbf16, #tpu.memory_space<vmem>>, %arg3: memref<128x1xf32, #tpu.memory_space<vmem>>, %arg4: memref<1x2x256x256xbf16, #tpu.memory_space<vmem>>, %arg5: memref<1x1x256xf32, #tpu.memory_space<vmem>>, %arg6: memref<128x256xbf16, #tpu.memory_space<vmem>>) attributes {dimension_semantics = [#tpu.dimension_semantics<arbitrary>], iteration_bounds = array<i64: 3>, scalar_prefetch = 0 : i64, scratch_operands = 0 : i64, tpu.core_type = #tpu.core_type<tc>, window_params = [{pipeline_mode = #tpu.pipeline_mode<synchronous>, transform_indices = @transform_0, window_bounds = array<i64: 128, 256>}, {pipeline_mode = #tpu.pipeline_mode<synchronous>, transform_indices = @transform_1, window_bounds = array<i64: 128, 128>}, {pipeline_mode = #tpu.pipeline_mode<synchronous>, transform_indices = @transform_2, window_bounds = array<i64: 128, 1>}, {transform_indices = @transform_3, window_bounds = array<i64: 1, 2, 256, 256>}, {transform_indices = @transform_4, window_bounds = array<i64: 1, 1, 256>}, {pipeline_mode = #tpu.pipeline_mode<synchronous>, transform_indices = @transform_5, window_bounds = array<i64: 128, 256>}]} {
    %c0_i32 = arith.constant 0 : i32
    %0 = arith.cmpi eq, %arg0, %c0_i32 : i32
    %1 = arith.extui %0 : i1 to i32
    %c0_i32_0 = arith.constant 0 : i32
    %2 = arith.cmpi ne, %1, %c0_i32_0 : i32
    scf.if %2 {
      %c0_21 = arith.constant 0 : index
      %c0_22 = arith.constant 0 : index
      %25 = vector.load %arg1[%c0_21, %c0_22] : memref<128x256xbf16, #tpu.memory_space<vmem>>, vector<128x256xbf16>
      %c0_23 = arith.constant 0 : index
      %c0_24 = arith.constant 0 : index
      %26 = vector.load %arg6[%c0_23, %c0_24] : memref<128x256xbf16, #tpu.memory_space<vmem>>, vector<128x256xbf16>
      tpu.vector_store %arg6[%c0_23, %c0_24], %25 {strides = array<i32>} : memref<128x256xbf16, #tpu.memory_space<vmem>>, vector<128x256xbf16>,
    } else {
    }
    %c0 = arith.constant 0 : index
    %c0_1 = arith.constant 0 : index
    %3 = vector.load %arg6[%c0, %c0_1] : memref<128x256xbf16, #tpu.memory_space<vmem>>, vector<128x256xbf16>
    %c0_2 = arith.constant 0 : index
    %c0_3 = arith.constant 0 : index
    %4 = vector.load %arg2[%c0_2, %c0_3] : memref<128x128xbf16, #tpu.memory_space<vmem>>, vector<128x128xbf16>
    %cst = arith.constant dense<0.000000e+00> : vector<128x256xf32>
    %5 = tpu.matmul %4, %3, %cst {dimension_numbers = #tpu.dot_dimension_numbers<[1], [0], [0], [1], [0, 0, 1, 1], [], []>} : vector<128x128xbf16>, vector<128x256xbf16>, vector<128x256xf32> -> vector<128x256xf32>
    %c0_4 = arith.constant 0 : index
    %c0_5 = arith.constant 0 : index
    %6 = vector.load %arg3[%c0_4, %c0_5] : memref<128x1xf32, #tpu.memory_space<vmem>>, vector<128x1xf32>
    %7 = vector.broadcast %6 : vector<128x1xf32> to vector<128x256xf32>
    %8 = arith.mulf %5, %7 : vector<128x256xf32>
    %9 = arith.truncf %8 : vector<128x256xf32> to vector<128x256xbf16>
    %c0_6 = arith.constant 0 : index
    %c0_7 = arith.constant 0 : index
    %c0_8 = arith.constant 0 : index
    %c0_9 = arith.constant 0 : index
    %10 = vector.load %arg4[%c0_6, %c0_7, %c0_8, %c0_9] : memref<1x2x256x256xbf16, #tpu.memory_space<vmem>>, vector<1x1x256x256xbf16>
    %11 = vector.shape_cast %10 : vector<1x1x256x256xbf16> to vector<256x256xbf16>
    %cst_10 = arith.constant dense<0.000000e+00> : vector<128x256xf32>
    %12 = tpu.matmul %9, %11, %cst_10 {dimension_numbers = #tpu.dot_dimension_numbers<[1], [0], [0], [1], [0, 0, 1, 1], [], []>} : vector<128x256xbf16>, vector<256x256xbf16>, vector<128x256xf32> -> vector<128x256xf32>
    %c0_11 = arith.constant 0 : index
    %c1 = arith.constant 1 : index
    %c0_12 = arith.constant 0 : index
    %c0_13 = arith.constant 0 : index
    %13 = vector.load %arg4[%c0_11, %c1, %c0_12, %c0_13] : memref<1x2x256x256xbf16, #tpu.memory_space<vmem>>, vector<1x1x256x256xbf16>
    %14 = vector.shape_cast %13 : vector<1x1x256x256xbf16> to vector<256x256xbf16>
    %cst_14 = arith.constant dense<0.000000e+00> : vector<128x256xf32>
    %15 = tpu.matmul %3, %14, %cst_14 {dimension_numbers = #tpu.dot_dimension_numbers<[1], [0], [0], [1], [0, 0, 1, 1], [], []>} : vector<128x256xbf16>, vector<256x256xbf16>, vector<128x256xf32> -> vector<128x256xf32>
    %16 = arith.addf %12, %15 : vector<128x256xf32>
    %c0_15 = arith.constant 0 : index
    %c0_16 = arith.constant 0 : index
    %c0_17 = arith.constant 0 : index
    %17 = vector.load %arg5[%c0_15, %c0_16, %c0_17] : memref<1x1x256xf32, #tpu.memory_space<vmem>>, vector<1x1x256xf32>
    %18 = vector.shape_cast %17 : vector<1x1x256xf32> to vector<1x256xf32>
    %19 = vector.broadcast %18 : vector<1x256xf32> to vector<128x256xf32>
    %20 = arith.addf %16, %19 : vector<128x256xf32>
    %cst_18 = arith.constant 0.000000e+00 : f32
    %21 = vector.broadcast %cst_18 : f32 to vector<128x256xf32>
    %22 = arith.maximumf %20, %21 : vector<128x256xf32>
    %23 = arith.truncf %22 : vector<128x256xf32> to vector<128x256xbf16>
    %c0_19 = arith.constant 0 : index
    %c0_20 = arith.constant 0 : index
    %24 = vector.load %arg6[%c0_19, %c0_20] : memref<128x256xbf16, #tpu.memory_space<vmem>>, vector<128x256xbf16>
    tpu.vector_store %arg6[%c0_19, %c0_20], %23 {strides = array<i32>} : memref<128x256xbf16, #tpu.memory_space<vmem>>, vector<128x256xbf16>,
    return
  }
  func.func @transform_0(%arg0: i32) -> (i32, i32) {
    %c0_i32 = arith.constant 0 : i32
    %c0_i32_0 = arith.constant 0 : i32
    %c0_i32_1 = arith.constant 0 : i32
    return %c0_i32, %c0_i32_0 : i32, i32
  }
  func.func @transform_1(%arg0: i32) -> (i32, i32) {
    %c0_i32 = arith.constant 0 : i32
    %c0_i32_0 = arith.constant 0 : i32
    %c0_i32_1 = arith.constant 0 : i32
    return %c0_i32, %c0_i32_0 : i32, i32
  }
  func.func @transform_2(%arg0: i32) -> (i32, i32) {
    %c0_i32 = arith.constant 0 : i32
    %c0_i32_0 = arith.constant 0 : i32
    %c0_i32_1 = arith.constant 0 : i32
    return %c0_i32, %c0_i32_0 : i32, i32
  }
  func.func @transform_3(%arg0: i32) -> (i32, i32, i32, i32) {
    %c0_i32 = arith.constant 0 : i32
    %c0_i32_0 = arith.constant 0 : i32
    %c0_i32_1 = arith.constant 0 : i32
    %c0_i32_2 = arith.constant 0 : i32
    return %arg0, %c0_i32, %c0_i32_0, %c0_i32_1 : i32, i32, i32, i32
  }
  func.func @transform_4(%arg0: i32) -> (i32, i32, i32) {
    %c0_i32 = arith.constant 0 : i32
    %c0_i32_0 = arith.constant 0 : i32
    %c0_i32_1 = arith.constant 0 : i32
    return %arg0, %c0_i32, %c0_i32_0 : i32, i32, i32
  }
  func.func @transform_5(%arg0: i32) -> (i32, i32) {
    %c0_i32 = arith.constant 0 : i32
    %c0_i32_0 = arith.constant 0 : i32
    %c0_i32_1 = arith.constant 0 : i32
    return %c0_i32, %c0_i32_0 : i32, i32
  }
}

</mosaic_0001>

<bundles_post_ra>
// kernel: cocktail_gnn_forward.1
= control target key start
LH: loop header
LB: loop body
LE: loop exit
PB: predicated region body
PF: predicated region fallthrough
CT: control target
= control target key end

     0   :  { %s1893_s18 = smov 0   ;;  %s2509_s0 = inlined_call_operand.vmem [shape: bf16[128,256], index: 0, kind: input, shape index: {}]   ;;  %s2510_s1 = inlined_call_operand.vmem [shape: bf16[128,128], index: 1, kind: input, shape index: {}]   ;;  %s2511_s2 = inlined_call_operand.vmem [shape: f32[128,1], index: 2, kind: input, shape index: {}]   ;;  %s2512_s3 = inlined_call_operand.vmem [shape: bf16[3,2,256,256], index: 3, kind: input, shape index: {}]   ;;  %s2513_s4 = inlined_call_operand.vmem [shape: f32[3,1,256], index: 4, kind: input, shape index: {}]   ;;  %s2514_s5 = inlined_call_operand.vmem [shape: bf16[128,256], index: 5, kind: output, shape index: {}]  }
   0x1 LB: > { %s1520_s19 = sadd.s32 4294967295, %s1860_s18   ;;  %p1523_p0 = scmp.ge.s32.totalorder %s1860_s18, 1  ;;  %s1860_s18 = sphi %s1893_s18, %s15_s18  }
   0x2   : > { %p191_p1 = scmp.lt.s32.totalorder %s1860_s18, 4 }
   0x4   : > { %p192_p2 = pnand %p1523_p0, %p191_p1 }
   0x5   : > { %p218_p3 = scmp.lt.s32.totalorder (!%p192_p2), %s1520_s19, 2  ;;  %p1527_p4 = scmp.ne.s32.totalorder (!%p192_p2), %s1520_s19, 0 }
   0x6   : > { %195 = sbr.rel (%p192_p2) target bundleno = 533 (0x215), region = 40 }
   0xb   : > { %s219_s20 = scalar_select %p218_p3, %s1520_s19, 2 }
   0xc   : > { %231 = sbr.rel (%p1527_p4) target bundleno = 26 (0x1a), region = 44 }
   0xd   : > { %s1666_s21 = sshll.u32 %s219_s20, 9  ;;  %s1526_s22 = sshll.u32 %s219_s20, 1 }
   0xe   : > { %s1904_s25 = scalar_lea.vmem %s2512_s3, %s1666_s21  ;;  %s1909_s28 = scalar_lea.vmem %s2513_s4, %s1526_s22 }
  0x11   : > { %v232_v0 = vld [vmem:[%s2509_s0] sm:$0xff]  ;;  %v233_v1 = vld [vmem:[%s2509_s0 + $0x8] sm:$0xff]  ;;  %v234_v2 = vld [vmem:[%s2509_s0 + $0x10] sm:$0xff] }
  0x12   : > { %248 = vst [vmem:[%s2514_s5] sm:$0xff] %v232_v0  ;;  %249 = vst [vmem:[%s2514_s5 + $0x8] sm:$0xff] %v233_v1  ;;  %v235_v3 = vld [vmem:[%s2509_s0 + $0x18] sm:$0xff]  ;;  %v236_v4 = vld [vmem:[%s2509_s0 + $0x20] sm:$0xff] }
  0x13   : > { %250 = vst [vmem:[%s2514_s5 + $0x10] sm:$0xff] %v234_v2  ;;  %v237_v5 = vld [vmem:[%s2509_s0 + $0x28] sm:$0xff]  ;;  %251 = vst [vmem:[%s2514_s5 + $0x18] sm:$0xff] %v235_v3  ;;  %v238_v6 = vld [vmem:[%s2509_s0 + $0x30] sm:$0xff] }
  0x14   : > { %252 = vst [vmem:[%s2514_s5 + $0x20] sm:$0xff] %v236_v4  ;;  %253 = vst [vmem:[%s2514_s5 + $0x28] sm:$0xff] %v237_v5  ;;  %v239_v7 = vld [vmem:[%s2509_s0 + $0x38] sm:$0xff]  ;;  %v240_v8 = vld [vmem:[%s2509_s0 + $0x40] sm:$0xff] }
  0x15   : > { %254 = vst [vmem:[%s2514_s5 + $0x30] sm:$0xff] %v238_v6  ;;  %255 = vst [vmem:[%s2514_s5 + $0x38] sm:$0xff] %v239_v7  ;;  %v241_v9 = vld [vmem:[%s2509_s0 + $0x48] sm:$0xff]  ;;  %v242_v10 = vld [vmem:[%s2509_s0 + $0x50] sm:$0xff] }
  0x16   : > { %256 = vst [vmem:[%s2514_s5 + $0x40] sm:$0xff] %v240_v8  ;;  %v243_v11 = vld [vmem:[%s2509_s0 + $0x58] sm:$0xff]  ;;  %257 = vst [vmem:[%s2514_s5 + $0x48] sm:$0xff] %v241_v9  ;;  %v244_v12 = vld [vmem:[%s2509_s0 + $0x60] sm:$0xff] }
  0x17   : > { %258 = vst [vmem:[%s2514_s5 + $0x50] sm:$0xff] %v242_v10  ;;  %259 = vst [vmem:[%s2514_s5 + $0x58] sm:$0xff] %v243_v11  ;;  %v245_v13 = vld [vmem:[%s2509_s0 + $0x68] sm:$0xff]  ;;  %v246_v14 = vld [vmem:[%s2509_s0 + $0x70] sm:$0xff] }
  0x18   : > { %260 = vst [vmem:[%s2514_s5 + $0x60] sm:$0xff] %v244_v12  ;;  %261 = vst [vmem:[%s2514_s5 + $0x68] sm:$0xff] %v245_v13  ;;  %v247_v15 = vld [vmem:[%s2509_s0 + $0x78] sm:$0xff] }
  0x19   : > { %262 = vst [vmem:[%s2514_s5 + $0x70] sm:$0xff] %v246_v14  ;;  %263 = vst [vmem:[%s2514_s5 + $0x78] sm:$0xff] %v247_v15 }
  0x1a PF: > { %v1862_v18 = vmov 0   ;;  %v1747_v24 = vld [vmem:[%s2514_s5 + $0x4] ss:$8 sps:$4 sm:$0xff]   ;;  %v539_v31 = vld [vmem:[%s2511_s2 + $0x10] sm:$0xff]  ;;  %v540_v34 = vld [vmem:[%s2511_s2 + $0x18] sm:$0xff] }
  0x1b   : > { %456 = vmatprep.mubr.bf16.mxu0 %v1862_v18  ;;  %1724 = vset.pattern.permute.xlu0 %v1862_v18  ;;  %v2075_v28 = vld [vmem:[%s2514_s5 + $0x24] ss:$8 sps:$4 sm:$0xff]   ;;  %v2084_v30 = vld [vmem:[%s2514_s5 + $0x20] ss:$8 sps:$4 sm:$0xff]   ;;  %v2093_v32 = vld [vmem:[%s2514_s5 + $0x14] ss:$8 sps:$4 sm:$0xff]  }
  0x1c   : > { %1725 = vset.pattern.permute.xlu1 %v1862_v18  ;;  %v2063_v26 = vld [vmem:[%s2514_s5 + $0x34] ss:$8 sps:$4 sm:$0xff]   ;;  %938 = vmatprep.mubr.bf16.mxu1 %v1747_v24  ;;  %v2069_v27 = vld [vmem:[%s2514_s5 + $0x30] ss:$8 sps:$4 sm:$0xff]   ;;  %v537_v29 = vld [vmem:[%s2511_s2] sm:$0xff] }
  0x1d   : > { %v2048_v23 = vld [vmem:[%s2514_s5 + $0x44] ss:$8 sps:$4 sm:$0xff]   ;;  %v2057_v25 = vld [vmem:[%s2514_s5 + $0x40] ss:$8 sps:$4 sm:$0xff]   ;;  %555 = vperm.xlu0 %1724, %v537_v29   ;;  %565 = vperm.xlu1 %1725, %v539_v31   ;;  %v2105_v35 = vld [vmem:[%s2514_s5 + $0x10] ss:$8 sps:$4 sm:$0xff]  }
  0x1e   : > { %v2036_v21 = vld [vmem:[%s2514_s5 + $0x54] ss:$8 sps:$4 sm:$0xff]   ;;  %v2042_v22 = vld [vmem:[%s2514_s5 + $0x50] ss:$8 sps:$4 sm:$0xff]   ;;  %v538_v33 = vld [vmem:[%s2511_s2 + $0x8] sm:$0xff] }
  0x1f   : > { %v2023_v19 = vld [vmem:[%s2514_s5 + $0x64] ss:$8 sps:$4 sm:$0xff]   ;;  %v2030_v20 = vld [vmem:[%s2514_s5 + $0x60] ss:$8 sps:$4 sm:$0xff]   ;;  %v1758_v38 = vld [vmem:[%s1904_s25 + $0x174] ss:$8 sps:$4 sm:$0xff]  }
  0x20   : > { %v2010_v16 = vld [vmem:[%s2514_s5 + $0x74] ss:$8 sps:$4 sm:$0xff]   ;;  %v2015_v17 = vld [vmem:[%s2514_s5 + $0x70] ss:$8 sps:$4 sm:$0xff]   ;;  %v541_v36 = vld [vmem:[%s2511_s2 + $0x20] sm:$0xff]  ;;  %906 = vmatprep.subr.bf16.mxu1 %v1758_v38 }
  0x21   : > { %424 = vmatprep.subr.bf16.mxu0 %v2010_v16  ;;  %560 = vperm.xlu0 %1724, %v538_v33   ;;  %v542_v37 = vld [vmem:[%s2511_s2 + $0x28] sm:$0xff]  ;;  %v1760_v39 = vld [vmem:[%s1904_s25 + $0x170] ss:$8 sps:$4 sm:$0xff]   ;;  %v1750_v43 = vld [vmem:[%s2510_s1] sm:$0xff]  }
  0x22   : > { %425 = vmatpush1.bf16.msra.mxu0 %v2015_v17  ;;  %570 = vperm.xlu1 %1725, %v540_v34   ;;  %v1761_v40 = vld [vmem:[%s1904_s25 + $0x164] ss:$8 sps:$4 sm:$0xff]   ;;  %v2121_v41 = vld [vmem:[%s2514_s5] ss:$8 sps:$4 sm:$0xff]   ;;  %v543_v42 = vld [vmem:[%s2511_s2 + $0x30] sm:$0xff] }
  0x23   : > { %426 = vmatprep.subr.bf16.mxu0 %v2023_v19  ;;  %v544_v44 = vld [vmem:[%s2511_s2 + $0x38] sm:$0xff]  ;;  %907 = vmatpush1.bf16.msra.mxu1 %v1760_v39  ;;  %v1763_v45 = vld [vmem:[%s1904_s25 + $0x160] ss:$8 sps:$4 sm:$0xff]   ;;  %v1767_v53 = vld [vmem:[%s1904_s25 + $0x144] ss:$8 sps:$4 sm:$0xff]  }
  0x24   : > { %v545_v46 = vld [vmem:[%s2511_s2 + $0x40] sm:$0xff]  ;;  %908 = vmatprep.subr.bf16.mxu1 %v1761_v40  ;;  %v1764_v47 = vld [vmem:[%s1904_s25 + $0x154] ss:$8 sps:$4 sm:$0xff]   ;;  %v546_v48 = vld [vmem:[%s2511_s2 + $0x48] sm:$0xff] }
  0x25   : > { %575 = vperm.xlu0 %1724, %v541_v36   ;;  %v1766_v49 = vld [vmem:[%s1904_s25 + $0x150] ss:$8 sps:$4 sm:$0xff]   ;;  %v2146_v51 = vld [vmem:[%s1904_s25 + $0x74] ss:$8 sps:$4 sm:$0xff]   ;;  %v549_v52 = vld [vmem:[%s2511_s2 + $0x60] sm:$0xff] }
  0x26   : > { %427 = vmatpush1.bf16.msra.mxu0 %v2030_v20  ;;  %580 = vperm.xlu1 %1725, %v542_v37   ;;  %v2143_v50 = vld [vmem:[%s1904_s25 + $0x70] ss:$8 sps:$4 sm:$0xff]   ;;  %v550_v54 = vld [vmem:[%s2511_s2 + $0x68] sm:$0xff]  ;;  %v1770_v60 = vld [vmem:[%s1904_s25 + $0x134] ss:$8 sps:$4 sm:$0xff]  }
  0x27   : > { %428 = vmatprep.subr.bf16.mxu0 %v2036_v21  ;;  %909 = vmatpush1.bf16.msra.mxu1 %v1763_v45  ;;  %v2157_v55 = vld [vmem:[%s1904_s25 + $0x64] ss:$8 sps:$4 sm:$0xff]   ;;  %v1769_v57 = vld [vmem:[%s1904_s25 + $0x140] ss:$8 sps:$4 sm:$0xff]   ;;  %v547_v59 = vld [vmem:[%s2511_s2 + $0x50] sm:$0xff] }
  0x28   : > { %910 = vmatprep.subr.bf16.mxu1 %v1764_v47  ;;  %v1751_v56 = vld [vmem:[%s2510_s1 + $0x8] sm:$0xff]   ;;  %v548_v61 = vld [vmem:[%s2511_s2 + $0x58] sm:$0xff]  ;;  %v551_v3 = vld [vmem:[%s2511_s2 + $0x70] sm:$0xff] }
  0x29   : > { %585 = vperm.xlu0 %1724, %v543_v42   ;;  %v2166_v58 = vld [vmem:[%s1904_s25 + $0x60] ss:$8 sps:$4 sm:$0xff]   ;;  %v1772_v62 = vld [vmem:[%s1904_s25 + $0x130] ss:$8 sps:$4 sm:$0xff]   ;;  %v2178_v63 = vld [vmem:[%s1904_s25 + $0x54] ss:$8 sps:$4 sm:$0xff]  }
  0x2a   : > { %429 = vmatpush1.bf16.msra.mxu0 %v2042_v22  ;;  %590 = vperm.xlu1 %1725, %v544_v44   ;;  %v2182_v0 = vld [vmem:[%s1904_s25 + $0x50] ss:$8 sps:$4 sm:$0xff]   ;;  %v1773_v1 = vld [vmem:[%s1904_s25 + $0x124] ss:$8 sps:$4 sm:$0xff]   ;;  %v1775_v5 = vld [vmem:[%s1904_s25 + $0x120] ss:$8 sps:$4 sm:$0xff]  }
  0x2b   : > { %430 = vmatprep.subr.bf16.mxu0 %v2048_v23  ;;  %911 = vmatpush1.bf16.msra.mxu1 %v1766_v49  ;;  %v2186_v2 = vld [vmem:[%s1904_s25 + $0x44] ss:$8 sps:$4 sm:$0xff]   ;;  %v552_v4 = vld [vmem:[%s2511_s2 + $0x78] sm:$0xff]  ;;  %v2199_v6 = vld [vmem:[%s1904_s25 + $0x40] ss:$8 sps:$4 sm:$0xff]  }
  0x2c   : > { %912 = vmatprep.subr.bf16.mxu1 %v1767_v53  ;;  %v1752_v7 = vld [vmem:[%s2510_s1 + $0x10] sm:$0xff]   ;;  %v1785_v12 = vld [vmem:[%s1904_s25 + $0x104] ss:$8 sps:$4 sm:$0xff]   ;;  %v1787_v14 = vld [vmem:[%s1904_s25 + $0x100] ss:$8 sps:$4 sm:$0xff]  }
  0x2d   : > { %595 = vperm.xlu0 %1724, %v545_v46   ;;  %v1779_v8 = vld [vmem:[%s1904_s25 + $0x114] ss:$8 sps:$4 sm:$0xff]   ;;  %v1781_v10 = vld [vmem:[%s1904_s25 + $0x110] ss:$8 sps:$4 sm:$0xff]   ;;  %v2216_v13 = vld [vmem:[%s1904_s25 + $0x24] ss:$8 sps:$4 sm:$0xff]  }
  0x2e   : > { %431 = vmatpush1.bf16.msra.mxu0 %v2057_v25  ;;  %600 = vperm.xlu1 %1725, %v546_v48   ;;  %v2207_v9 = vld [vmem:[%s1904_s25 + $0x34] ss:$8 sps:$4 sm:$0xff]   ;;  %v2212_v11 = vld [vmem:[%s1904_s25 + $0x30] ss:$8 sps:$4 sm:$0xff]   ;;  %v2223_v15 = vld [vmem:[%s1904_s25 + $0x20] ss:$8 sps:$4 sm:$0xff]  }
  0x2f   : > { %432 = vmatprep.subr.bf16.mxu0 %v2063_v26  ;;  %913 = vmatpush1.bf16.msra.mxu1 %v1769_v57  ;;  %v1791_v29 = vld [vmem:[%s1904_s25 + $0x1f4] ss:$8 sps:$4 sm:$0xff]   ;;  %v1793_v33 = vld [vmem:[%s1904_s25 + $0x1f0] ss:$8 sps:$4 sm:$0xff]   ;;  %v1797_v36 = vld [vmem:[%s1904_s25 + $0x1e4] ss:$8 sps:$4 sm:$0xff]  }
  0x30   : > { %914 = vmatprep.subr.bf16.mxu1 %v1770_v60  ;;  %v2231_v31 = vld [vmem:[%s1904_s25 + $0x14] ss:$8 sps:$4 sm:$0xff]   ;;  %v2236_v34 = vld [vmem:[%s1904_s25 + $0x10] ss:$8 sps:$4 sm:$0xff]   ;;  %v2240_v37 = vld [vmem:[%s1904_s25 + $0x4] ss:$8 sps:$4 sm:$0xff]  }
  0x31   : > { %615 = vperm.xlu0 %1724, %v549_v52   ;;  %v1754_v38 = vld [vmem:[%s2510_s1 + $0x20] sm:$0xff]   ;;  %v1803_v42 = vld [vmem:[%s1904_s25 + $0x1d4] ss:$8 sps:$4 sm:$0xff]   ;;  %v1805_v44 = vld [vmem:[%s1904_s25 + $0x1d0] ss:$8 sps:$4 sm:$0xff]  }
  0x32   : > { %433 = vmatpush1.bf16.msra.mxu0 %v2069_v27  ;;  %620 = vperm.xlu1 %1725, %v550_v54   ;;  %v1799_v39 = vld [vmem:[%s1904_s25 + $0x1e0] ss:$8 sps:$4 sm:$0xff]   ;;  %v2260_v45 = vld [vmem:[%s1904_s25 + $0xf0] ss:$8 sps:$4 sm:$0xff]   ;;  %v1809_v46 = vld [vmem:[%s1904_s25 + $0x1c4] ss:$8 sps:$4 sm:$0xff]  }
  0x33   : > { %434 = vmatprep.subr.bf16.mxu0 %v2075_v28  ;;  %915 = vmatpush1.bf16.msra.mxu1 %v1772_v62  ;;  %v2250_v40 = vld [vmem:[%s1904_s25] ss:$8 sps:$4 sm:$0xff]   ;;  %v2264_v47 = vld [vmem:[%s1904_s25 + $0xe4] ss:$8 sps:$4 sm:$0xff]   ;;  %v1815_v53 = vld [vmem:[%s1904_s25 + $0x1b4] ss:$8 sps:$4 sm:$0xff]  }
  0x34   : > { %916 = vmatprep.subr.bf16.mxu1 %v1773_v1  ;;  %v1811_v48 = vld [vmem:[%s1904_s25 + $0x1c0] ss:$8 sps:$4 sm:$0xff]   ;;  %v2279_v54 = vld [vmem:[%s1904_s25 + $0xd4] ss:$8 sps:$4 sm:$0xff]   ;;  %v2284_v57 = vld [vmem:[%s1904_s25 + $0xd0] ss:$8 sps:$4 sm:$0xff]  }
  0x35   : > { %605 = vperm.xlu0 %1724, %v547_v59   ;;  %v2271_v49 = vld [vmem:[%s1904_s25 + $0xe0] ss:$8 sps:$4 sm:$0xff]   ;;  %v1821_v59 = vld [vmem:[%s1904_s25 + $0x1a4] ss:$8 sps:$4 sm:$0xff]   ;;  %v1756_v1 = vld [vmem:[%s2510_s1 + $0x30] sm:$0xff]  }
  0x36   : > { %435 = vmatpush1.bf16.msra.mxu0 %v2084_v30  ;;  %610 = vperm.xlu1 %1725, %v548_v61   ;;  %v1755_v52 = vld [vmem:[%s2510_s1 + $0x28] sm:$0xff]  }
  0x37   : > { %436 = vmatprep.subr.bf16.mxu0 %v2093_v32  ;;  %917 = vmatpush1.bf16.msra.mxu1 %v1775_v5  ;;  %v2288_v60 = vld [vmem:[%s1904_s25 + $0xc4] ss:$8 sps:$4 sm:$0xff]   ;;  %v1823_v61 = vld [vmem:[%s1904_s25 + $0x1a0] ss:$8 sps:$4 sm:$0xff]   ;;  %v1829_v5 = vld [vmem:[%s1904_s25 + $0x190] ss:$8 sps:$4 sm:$0xff]  }
  0x38   : > { %918 = vmatprep.subr.bf16.mxu1 %v1779_v8  ;;  %v2295_v62 = vld [vmem:[%s1904_s25 + $0xc0] ss:$8 sps:$4 sm:$0xff]   ;;  %v1833_v8 = vld [vmem:[%s1904_s25 + $0x184] ss:$8 sps:$4 sm:$0xff]  }
  0x39   : > { %625 = vperm.xlu0 %1724, %v551_v3   ;;  %v1827_v3 = vld [vmem:[%s1904_s25 + $0x194] ss:$8 sps:$4 sm:$0xff]  }
  0x3a   : > { %437 = vmatpush1.bf16.msra.mxu0 %v2105_v35  ;;  %630 = vperm.xlu1 %1725, %v552_v4   ;;  %v2303_v4 = vld [vmem:[%s1904_s25 + $0xb4] ss:$8 sps:$4 sm:$0xff]  }
  0x3b   : > { %438 = vmatprep.subr.bf16.mxu0 %v1747_v24  ;;  %919 = vmatpush1.bf16.msra.mxu1 %v1781_v10  ;;  %v1753_v24 = vld [vmem:[%s2510_s1 + $0x18] sm:$0xff]   ;;  %v1835_v10 = vld [vmem:[%s1904_s25 + $0x180] ss:$8 sps:$4 sm:$0xff]  }
  0x3c   : > { %920 = vmatprep.subr.bf16.mxu1 %v1785_v12  ;;  %v1757_v12 = vld [vmem:[%s2510_s1 + $0x38] sm:$0xff]  }
  0x3e   : > { %439 = vmatpush1.bf16.msra.mxu0 %v2121_v41 }
  0x3f   : > { %1179 = vmatprep.subr.bf16.mxu0 %v2146_v51  ;;  %921 = vmatpush1.bf16.msra.mxu1 %v1787_v14  ;;  %v1845_v14 = vld [vmem:[%s1904_s25 + $0xa0] ss:$8 sps:$4 sm:$0xff]  }
  0x40   : > { %922 = vmatprep.subr.bf16.mxu1 %v1791_v29 }
  0x41   : > { %457 = vmatmul.mubr.bf16.vlgmr.msra.gmra.mxu0 %v1750_v43  ;;  %v2255_v43 = vld [vmem:[%s1904_s25 + $0xf4] ss:$8 sps:$4 sm:$0xff]  }
  0x42   : > { %466 = vmatprep.mubr.bf16.mxu0 %v1862_v18  ;;  %1180 = vmatpush1.bf16.msra.mxu0 %v2143_v50 }
  0x43   : > { %1181 = vmatprep.subr.bf16.mxu0 %v2157_v55  ;;  %923 = vmatpush2.bf16.msra.mxu1 %v1793_v33 }
  0x44   : > { %924 = vmatprep.subr.bf16.mxu1 %v1797_v36 }
  0x46   : > { %1182 = vmatpush1.bf16.msra.mxu0 %v2166_v58 }
  0x47   : > { %1183 = vmatprep.subr.bf16.mxu0 %v2178_v63  ;;  %925 = vmatpush2.bf16.msra.mxu1 %v1799_v39 }
  0x48   : > { %926 = vmatprep.subr.bf16.mxu1 %v1803_v42 }
  0x49   : > { %467 = vmatmul.mubr.bf16.gmra.mxu0 %v1751_v56  ;;  %v1817_v56 = vld [vmem:[%s1904_s25 + $0x1b0] ss:$8 sps:$4 sm:$0xff]  }
  0x4a   : > { %476 = vmatprep.mubr.bf16.mxu0 %v1862_v18  ;;  %1184 = vmatpush1.bf16.msra.mxu0 %v2182_v0 }
  0x4b   : > { %1185 = vmatprep.subr.bf16.mxu0 %v2186_v2  ;;  %927 = vmatpush2.bf16.msra.mxu1 %v1805_v44 }
  0x4c   : > { %928 = vmatprep.subr.bf16.mxu1 %v1809_v46 }
  0x4e   : > { %1186 = vmatpush1.bf16.msra.mxu0 %v2199_v6 }
  0x4f   : > { %1187 = vmatprep.subr.bf16.mxu0 %v2207_v9  ;;  %929 = vmatpush2.bf16.msra.mxu1 %v1811_v48 }
  0x50   : > { %930 = vmatprep.subr.bf16.mxu1 %v1815_v53 }
  0x51   : > { %477 = vmatmul.mubr.bf16.gmra.mxu0 %v1752_v7  ;;  %v1842_v7 = vld [vmem:[%s1904_s25 + $0xb0] ss:$8 sps:$4 sm:$0xff]  }
  0x52   : > { %486 = vmatprep.mubr.bf16.mxu0 %v1862_v18  ;;  %1188 = vmatpush1.bf16.msra.mxu0 %v2212_v11 }
  0x53   : > { %1189 = vmatprep.subr.bf16.mxu0 %v2216_v13  ;;  %931 = vmatpush2.bf16.msra.mxu1 %v1817_v56 }
  0x54   : > { %932 = vmatprep.subr.bf16.mxu1 %v1821_v59 }
  0x56   : > { %1190 = vmatpush1.bf16.msra.mxu0 %v2223_v15 }
  0x57   : > { %1191 = vmatprep.subr.bf16.mxu0 %v2231_v31  ;;  %933 = vmatpush2.bf16.msra.mxu1 %v1823_v61 }
  0x58   : > { %934 = vmatprep.subr.bf16.mxu1 %v1827_v3 }
  0x59   : > { %487 = vmatmul.mubr.bf16.gmra.mxu0 %v1753_v24 }
  0x5a   : > { %496 = vmatprep.mubr.bf16.mxu0 %v1862_v18  ;;  %1192 = vmatpush1.bf16.msra.mxu0 %v2236_v34 }
  0x5b   : > { %1193 = vmatprep.subr.bf16.mxu0 %v2240_v37  ;;  %935 = vmatpush2.bf16.msra.mxu1 %v1829_v5 }
  0x5c   : > { %936 = vmatprep.subr.bf16.mxu1 %v1833_v8 }
  0x5e   : > { %1194 = vmatpush1.bf16.msra.mxu0 %v2250_v40 }
  0x5f   : > { %1195 = vmatprep.subr.bf16.mxu0 %v2255_v43  ;;  %937 = vmatpush2.bf16.msra.mxu1 %v1835_v10 }
  0x60   : > { %1683 = vmatprep.subr.bf16.mxu1 %v2146_v51  ;;  %v1850_v51 = vld [vmem:[%s1904_s25 + $0x94] ss:$8 sps:$4 sm:$0xff]  }
  0x61   : > { %497 = vmatmul.mubr.bf16.gmra.mxu0 %v1754_v38 }
  0x62   : > { %506 = vmatprep.mubr.bf16.mxu0 %v1862_v18  ;;  %1196 = vmatpush2.bf16.msra.mxu0 %v2260_v45 }
  0x63   : > { %1197 = vmatprep.subr.bf16.mxu0 %v2264_v47  ;;  %939 = vmatmul.mubr.bf16.vlgmr.msra.gmra.mxu1 %v2121_v41  ;;  %v1848_v41 = vld [vmem:[%s1904_s25 + $0x90] ss:$8 sps:$4 sm:$0xff]  }
  0x64   : > { %1699 = vmatpush1.bf16.msra.mxu1 %v2143_v50  ;;  %948 = vmatprep.mubr.bf16.mxu1 %v2093_v32  ;;  %v1853_v32 = vld [vmem:[%s1904_s25 + $0x84] ss:$8 sps:$4 sm:$0xff]   ;;  %v1851_v50 = vld [vmem:[%s1904_s25 + $0x80] ss:$8 sps:$4 sm:$0xff]  }
  0x65   : > { %1684 = vmatprep.subr.bf16.mxu1 %v2157_v55 }
  0x66   : > { %1198 = vmatpush2.bf16.msra.mxu0 %v2271_v49 }
  0x67   : > { %1199 = vmatprep.subr.bf16.mxu0 %v2279_v54 }
  0x68   : > { %1700 = vmatpush1.bf16.msra.mxu1 %v2166_v58 }
  0x69   : > { %507 = vmatmul.mubr.bf16.gmra.mxu0 %v1755_v52  ;;  %1685 = vmatprep.subr.bf16.mxu1 %v2178_v63 }
  0x6a   : > { %516 = vmatprep.mubr.bf16.mxu0 %v1862_v18  ;;  %1200 = vmatpush2.bf16.msra.mxu0 %v2284_v57 }
  0x6b   : > { %1201 = vmatprep.subr.bf16.mxu0 %v2288_v60  ;;  %949 = vmatmul.mubr.bf16.gmra.mxu1 %v2105_v35 }
  0x6c   : > { %1701 = vmatpush1.bf16.msra.mxu1 %v2182_v0  ;;  %958 = vmatprep.mubr.bf16.mxu1 %v2075_v28 }
  0x6d   : > { %1686 = vmatprep.subr.bf16.mxu1 %v2186_v2 }
  0x6e   : > { %1202 = vmatpush2.bf16.msra.mxu0 %v2295_v62 }
  0x6f   : > { %1203 = vmatprep.subr.bf16.mxu0 %v2303_v4 }
  0x70   : > { %1702 = vmatpush1.bf16.msra.mxu1 %v2199_v6 }
  0x71   : > { %517 = vmatmul.mubr.bf16.gmra.mxu0 %v1756_v1  ;;  %1687 = vmatprep.subr.bf16.mxu1 %v2207_v9 }
  0x72   : > { %526 = vmatprep.mubr.bf16.mxu0 %v1862_v18  ;;  %1204 = vmatpush2.bf16.msra.mxu0 %v1842_v7  ;;  %v1847_v18 = vld [vmem:[%s1904_s25 + $0xa4] ss:$8 sps:$4 sm:$0xff]  }
  0x73   : > { %1205 = vmatprep.subr.bf16.mxu0 %v1847_v18  ;;  %959 = vmatmul.mubr.bf16.gmra.mxu1 %v2084_v30 }
  0x74   : > { %1703 = vmatpush1.bf16.msra.mxu1 %v2212_v11  ;;  %968 = vmatprep.mubr.bf16.mxu1 %v2063_v26 }
  0x75   : > { %1688 = vmatprep.subr.bf16.mxu1 %v2216_v13 }
  0x76   : > { %1206 = vmatpush2.bf16.msra.mxu0 %v1845_v14 }
  0x77   : > { %1207 = vmatprep.subr.bf16.mxu0 %v1850_v51 }
  0x78   : > { %1704 = vmatpush1.bf16.msra.mxu1 %v2223_v15 }
  0x79   : > { %527 = vmatmul.mubr.bf16.gmra.mxu0 %v1757_v12  ;;  %1689 = vmatprep.subr.bf16.mxu1 %v2231_v31 }
  0x7a   : > { %1208 = vmatpush2.bf16.msra.mxu0 %v1848_v41 }
  0x7b   : > { %1209 = vmatprep.subr.bf16.mxu0 %v1853_v32  ;;  %969 = vmatmul.mubr.bf16.gmra.mxu1 %v2069_v27 }
  0x7c   : > { %1705 = vmatpush1.bf16.msra.mxu1 %v2236_v34  ;;  %978 = vmatprep.mubr.bf16.mxu1 %v2048_v23 }
  0x7d   : > { %1690 = vmatprep.subr.bf16.mxu1 %v2240_v37 }
  0x7e   : > { %1210 = vmatpush2.bf16.msra.mxu0 %v1851_v50 }
  0x80   : > { %1706 = vmatpush1.bf16.msra.mxu1 %v2250_v40 }
  0x81   : > { %1691 = vmatprep.subr.bf16.mxu1 %v2255_v43 }
  0x83   : > { %979 = vmatmul.mubr.bf16.gmra.mxu1 %v2057_v25 }
  0x84   : > { %1707 = vmatpush2.bf16.msra.mxu1 %v2260_v45  ;;  %988 = vmatprep.mubr.bf16.mxu1 %v2036_v21 }
  0x85   : > { %1692 = vmatprep.subr.bf16.mxu1 %v2264_v47 }
  0x88   : > { %1708 = vmatpush2.bf16.msra.mxu1 %v2271_v49 }
  0x89   : > { %1693 = vmatprep.subr.bf16.mxu1 %v2279_v54 }
  0x8b   : > { %989 = vmatmul.mubr.bf16.gmra.mxu1 %v2042_v22 }
  0x8c   : > { %1709 = vmatpush2.bf16.msra.mxu1 %v2284_v57  ;;  %998 = vmatprep.mubr.bf16.mxu1 %v2023_v19 }
  0x8d   : > { %1694 = vmatprep.subr.bf16.mxu1 %v2288_v60 }
  0x90   : > { %1710 = vmatpush2.bf16.msra.mxu1 %v2295_v62 }
  0x91   : > { %1695 = vmatprep.subr.bf16.mxu1 %v2303_v4 }
  0x93   : > { %999 = vmatmul.mubr.bf16.gmra.mxu1 %v2030_v20 }
  0x94   : > { %1711 = vmatpush2.bf16.msra.mxu1 %v1842_v7  ;;  %1008 = vmatprep.mubr.bf16.mxu1 %v2010_v16 }
  0x95   : > { %1696 = vmatprep.subr.bf16.mxu1 %v1847_v18 }
  0x98   : > { %1712 = vmatpush2.bf16.msra.mxu1 %v1845_v14  ;;  %v556_v19 = vpop.permute.xlu0 %555  ;;  %v566_v28 = vpop.permute.xlu1 %565 }
  0x99   : > { %1697 = vmatprep.subr.bf16.mxu1 %v1850_v51 }
  0x9b   : > { %1009 = vmatmul.mubr.bf16.gmra.mxu1 %v2015_v17 }
  0x9c   : > { %1713 = vmatpush2.bf16.msra.mxu1 %v1848_v41  ;;  %v561_v25 = vpop.permute.xlu0 %560 }
  0x9d   : > { %1698 = vmatprep.subr.bf16.mxu1 %v1853_v32  ;;  %v571_v0 = vpop.permute.xlu1 %570 }
  0xa0   : > { %1714 = vmatpush2.bf16.msra.mxu1 %v1851_v50  ;;  %v576_v36 = vpop.permute.xlu0 %575 }
  0xa1   : > { %v581_v34 = vpop.permute.xlu1 %580 }
  0xa4   : > { %v586_v48 = vpop.permute.xlu0 %585 }
  0xa5   : > { %v591_v47 = vpop.permute.xlu1 %590 }
  0xa8   : > { %v596_v62 = vpop.permute.xlu0 %595 }
  0xa9   : > { %v601_v60 = vpop.permute.xlu1 %600 }
  0xac   : > { %v616_v18 = vpop.permute.xlu0 %615 }
  0xad   : > { %v621_v8 = vpop.permute.xlu1 %620 }
 0x101   : > { %v458_v21 = vpop.f32.mrf.mxu0 }
 0x102   : > { %v633_v35 = vmul.f32 %v556_v19, %v458_v21  ;;  %v611_v21 = vpop.permute.xlu1 %610 }
 0x103   : > { %v460_v22 = vpop.f32.mrf.mxu0 }
 0x104   : > { %v634_v20 = vmul.f32 %v556_v19, %v460_v22  ;;  %v606_v22 = vpop.permute.xlu0 %605 }
 0x105   : > { %v462_v23 = vpop.f32.mrf.mxu0 }
 0x106   : > { %v635_v26 = vmul.f32 %v561_v25, %v462_v23 }
 0x107   : > { %v464_v27 = vpop.f32.mrf.mxu0 }
 0x108   : > { %v636_v30 = vmul.f32 %v561_v25, %v464_v27  ;;  %v665_v58 = vpack.c.bf16 %v635_v26, %v633_v35 }
 0x109   : > { %v468_v16 = vpop.f32.mrf.mxu0 }
 0x10a   : > { %v666_v55 = vpack.c.bf16 %v636_v30, %v634_v20  ;;  %v637_v13 = vmul.f32 %v566_v28, %v468_v16 }
 0x10b   : > { %v470_v63 = vpop.f32.mrf.mxu0 }
 0x10c   : > { %1211 = vmatprep.mubr.bf16.mxu0 %v666_v55  ;;  %v638_v9 = vmul.f32 %v566_v28, %v470_v63 }
 0x10d   : > { %v472_v17 = vpop.f32.mrf.mxu0  ;;  %1212 = vmatmul.mubr.bf16.vlgmr.msra.gmra.mxu0 %v665_v58 }
 0x10e   : > { %v639_v2 = vmul.f32 %v571_v0, %v472_v17 }
 0x10f   : > { %v474_v6 = vpop.f32.mrf.mxu0 }
 0x110   : > { %v640_v11 = vmul.f32 %v571_v0, %v474_v6  ;;  %v667_v29 = vpack.c.bf16 %v639_v2, %v637_v13 }
 0x111   : > { %v478_v15 = vpop.f32.mrf.mxu0 }
 0x112   : > { %v668_v24 = vpack.c.bf16 %v640_v11, %v638_v9  ;;  %v641_v42 = vmul.f32 %v576_v36, %v478_v15 }
 0x113   : > { %v480_v31 = vpop.f32.mrf.mxu0 }
 0x114   : > { %1221 = vmatprep.mubr.bf16.mxu0 %v668_v24  ;;  %v642_v39 = vmul.f32 %v576_v36, %v480_v31  ;;  %v631_v24 = vpop.permute.xlu1 %630 }
 0x115   : > { %v482_v33 = vpop.f32.mrf.mxu0  ;;  %1222 = vmatmul.mubr.bf16.gmra.mxu0 %v667_v29  ;;  %v626_v29 = vpop.permute.xlu0 %625 }
 0x116   : > { %v643_v37 = vmul.f32 %v581_v34, %v482_v33 }
 0x117   : > { %v484_v38 = vpop.f32.mrf.mxu0 }
 0x118   : > { %v644_v40 = vmul.f32 %v581_v34, %v484_v38  ;;  %v669_v45 = vpack.c.bf16 %v643_v37, %v641_v42 }
 0x119   : > { %v488_v43 = vpop.f32.mrf.mxu0 }
 0x11a   : > { %v670_v44 = vpack.c.bf16 %v644_v40, %v642_v39  ;;  %v645_v57 = vmul.f32 %v586_v48, %v488_v43 }
 0x11b   : > { %v490_v46 = vpop.f32.mrf.mxu0 }
 0x11c   : > { %1231 = vmatprep.mubr.bf16.mxu0 %v670_v44  ;;  %v646_v54 = vmul.f32 %v586_v48, %v490_v46 }
 0x11d   : > { %v492_v49 = vpop.f32.mrf.mxu0  ;;  %1232 = vmatmul.mubr.bf16.gmra.mxu0 %v669_v45 }
 0x11e   : > { %v647_v52 = vmul.f32 %v591_v47, %v492_v49 }
 0x11f   : > { %v494_v53 = vpop.f32.mrf.mxu0 }
 0x120   : > { %v648_v56 = vmul.f32 %v591_v47, %v494_v53  ;;  %v671_v1 = vpack.c.bf16 %v647_v52, %v645_v57 }
 0x121   : > { %v498_v59 = vpop.f32.mrf.mxu0 }
 0x122   : > { %v672_v61 = vpack.c.bf16 %v648_v56, %v646_v54  ;;  %v649_v14 = vmul.f32 %v596_v62, %v498_v59 }
 0x123   : > { %v500_v3 = vpop.f32.mrf.mxu0  ;;  %v940_v40 = vpop.f32.mrf.mxu1 }
 0x124   : > { %1241 = vmatprep.mubr.bf16.mxu0 %v672_v61  ;;  %v650_v10 = vmul.f32 %v596_v62, %v500_v3  ;;  %v1294_v62 = vlaneseq }
 0x125   : > { %v502_v4 = vpop.f32.mrf.mxu0  ;;  %1242 = vmatmul.mubr.bf16.gmra.mxu0 %v671_v1  ;;  %v942_v42 = vpop.f32.mrf.mxu1 }
 0x126   : > { %v651_v5 = vmul.f32 %v601_v60, %v502_v4  ;;  %v1295_v3 = vshrl.u32 %v1294_v62, 7 }
 0x127   : > { %v504_v7 = vpop.f32.mrf.mxu0  ;;  %v944_v43 = vpop.f32.mrf.mxu1 }
 0x128   : > { %v652_v12 = vmul.f32 %v601_v60, %v504_v7  ;;  %v673_v32 = vpack.c.bf16 %v651_v5, %v649_v14  ;;  %v1296_v5 = vsub.s32 0, %v1295_v3  ;;  %v1292_v7 = vld [vmem:[%s1909_s28] sm:$0x3] }
 0x129   : > { %v508_v51 = vpop.f32.mrf.mxu0  ;;  %v946_v44 = vpop.f32.mrf.mxu1 }
 0x12a   : > { %v674_v41 = vpack.c.bf16 %v652_v12, %v650_v10  ;;  %v653_v28 = vmul.f32 %v606_v22, %v508_v51  ;;  %v2384_v12 = vrot.slane %v1292_v7, %v1296_v5 }
 0x12b   : > { %v510_v50 = vpop.f32.mrf.mxu0  ;;  %v950_v45 = vpop.f32.mrf.mxu1 }
 0x12c   : > { %1251 = vmatprep.mubr.bf16.mxu0 %v674_v41  ;;  %v654_v26 = vmul.f32 %v606_v22, %v510_v50 }
 0x12d   : > { %v512_v19 = vpop.f32.mrf.mxu0  ;;  %1252 = vmatmul.mubr.bf16.gmra.mxu0 %v673_v32  ;;  %v952_v46 = vpop.f32.mrf.mxu1 }
 0x12e   : > { %v655_v23 = vmul.f32 %v611_v21, %v512_v19 }
 0x12f   : > { %v514_v25 = vpop.f32.mrf.mxu0  ;;  %v954_v47 = vpop.f32.mrf.mxu1 }
 0x130   : > { %v656_v27 = vmul.f32 %v611_v21, %v514_v25  ;;  %v675_v35 = vpack.c.bf16 %v655_v23, %v653_v28 }
 0x131   : > { %v518_v20 = vpop.f32.mrf.mxu0  ;;  %v956_v48 = vpop.f32.mrf.mxu1 }
 0x132   : > { %v676_v30 = vpack.c.bf16 %v656_v27, %v654_v26  ;;  %v657_v2 = vmul.f32 %v616_v18, %v518_v20 }
 0x133   : > { %v520_v16 = vpop.f32.mrf.mxu0  ;;  %v960_v49 = vpop.f32.mrf.mxu1 }
 0x134   : > { %1261 = vmatprep.mubr.bf16.mxu0 %v676_v30  ;;  %v658_v17 = vmul.f32 %v616_v18, %v520_v16 }
 0x135   : > { %v522_v55 = vpop.f32.mrf.mxu0  ;;  %1262 = vmatmul.mubr.bf16.gmra.mxu0 %v675_v35  ;;  %v2361_v52 = vpop.f32.mrf.mxu1 }
 0x136   : > { %v659_v58 = vmul.f32 %v621_v8, %v522_v55 }
 0x137   : > { %v524_v63 = vpop.f32.mrf.mxu0  ;;  %v2363_v53 = vpop.f32.mrf.mxu1 }
 0x138   : > { %v660_v0 = vmul.f32 %v621_v8, %v524_v63  ;;  %v677_v11 = vpack.c.bf16 %v659_v58, %v657_v2  ;;  %v1300_v8 = vsub.s32 1, %v1295_v3 }
 0x139   : > { %v528_v6 = vpop.f32.mrf.mxu0  ;;  %v2365_v54 = vpop.f32.mrf.mxu1 }
 0x13a   : > { %v678_v9 = vpack.c.bf16 %v660_v0, %v658_v17  ;;  %v661_v37 = vmul.f32 %v626_v29, %v528_v6  ;;  %v2386_v51 = vrot.slane %v1292_v7, %v1300_v8 }
 0x13b   : > { %v530_v13 = vpop.f32.mrf.mxu0  ;;  %v2367_v56 = vpop.f32.mrf.mxu1 }
 0x13c   : > { %1271 = vmatprep.mubr.bf16.mxu1 %v678_v9  ;;  %v662_v34 = vmul.f32 %v626_v29, %v530_v13 }
 0x13d   : > { %v532_v15 = vpop.f32.mrf.mxu0  ;;  %1272 = vmatmul.mubr.bf16.vlgmr.msra.gmra.mxu1 %v677_v11  ;;  %v2369_v57 = vpop.f32.mrf.mxu1 }
 0x13e   : > { %v663_v31 = vmul.f32 %v631_v24, %v532_v15 }
 0x13f   : > { %v534_v33 = vpop.f32.mrf.mxu0  ;;  %v2371_v59 = vpop.f32.mrf.mxu1 }
 0x140   : > { %v664_v36 = vmul.f32 %v631_v24, %v534_v33  ;;  %v679_v39 = vpack.c.bf16 %v663_v31, %v661_v37 }
 0x141   : > { %v2373_v60 = vpop.f32.mrf.mxu1 }
 0x142   : > { %v680_v38 = vpack.c.bf16 %v664_v36, %v662_v34 }
 0x143   : > { %v2375_v61 = vpop.f32.mrf.mxu1 }
 0x144   : > { %1281 = vmatprep.mubr.bf16.mxu1 %v680_v38 }
 0x145   : > { %1282 = vmatmul.mubr.bf16.gmra.mxu1 %v679_v39  ;;  %v2377_v1 = vpop.f32.mrf.mxu1 }
 0x147   : > { %v2379_v4 = vpop.f32.mrf.mxu1 }
 0x149   : > { %v2382_v10 = vpop.f32.mrf.mxu1 }
 0x14b   : > { %v2388_v32 = vpop.f32.mrf.mxu1 }
 0x14d   : > { %v2392_v26 = vpop.f32.mrf.mxu1 }
 0x14f   : > { %v2396_v17 = vpop.f32.mrf.mxu1 }
 0x151   : > { %v2403_v31 = vpop.f32.mrf.mxu1 }
 0x1cd   : > { %v1213_v18 = vpop.f32.mrf.mxu0 }
 0x1ce   : > { %v1214_v14 = vadd.f32 %v1213_v18, %v940_v40 }
 0x1cf   : > { %v1215_v41 = vpop.f32.mrf.mxu0 }
 0x1d0   : > { %v1304_v50 = vadd.f32 %v2384_v12, %v1214_v14  ;;  %v1216_v19 = vadd.f32 %v1215_v41, %v942_v42 }
 0x1d1   : > { %v1217_v21 = vpop.f32.mrf.mxu0 }
 0x1d2   : > { %v1305_v22 = vadd.f32 %v2386_v51, %v1216_v19  ;;  %v1218_v23 = vadd.f32 %v1217_v21, %v944_v43  ;;  %v1336_v27 = vmax.f32 %v1304_v50, 0.0 }
 0x1d3   : > { %v1219_v25 = vpop.f32.mrf.mxu0 }
 0x1d4   : > { %v1337_v28 = vmax.f32 %v1305_v22, 0.0  ;;  %v1306_v20 = vadd.f32 %v2384_v12, %v1218_v23  ;;  %v1220_v30 = vadd.f32 %v1219_v25, %v946_v44  ;;  %v2410_v44 = vpop.f32.mrf.mxu1 }
 0x1d5   : > { %v1223_v35 = vpop.f32.mrf.mxu0 }
 0x1d6   : > { %v1667_v16 = vpack.c.bf16 %v1337_v28, %v1336_v27  ;;  %v1307_v55 = vadd.f32 %v2386_v51, %v1220_v30  ;;  %v1224_v58 = vadd.f32 %v1223_v35, %v950_v45  ;;  %v1338_v0 = vmax.f32 %v1306_v20, 0.0  ;;  %v2419_v8 = vpop.f32.mrf.mxu1 }
 0x1d7   : > { %v1225_v63 = vpop.f32.mrf.mxu0 }
 0x1d8   : > { %1464 = vst [vmem:[%s2514_s5] sm:$0xff] %v1667_v16  ;;  %v1339_v2 = vmax.f32 %v1307_v55, 0.0  ;;  %v1308_v6 = vadd.f32 %v2384_v12, %v1224_v58  ;;  %v1226_v9 = vadd.f32 %v1225_v63, %v952_v46  ;;  %v2428_v23 = vpop.f32.mrf.mxu1 }
 0x1d9   : > { %v1227_v11 = vpop.f32.mrf.mxu0 }
 0x1da   : > { %v1668_v13 = vpack.c.bf16 %v1339_v2, %v1338_v0  ;;  %v1309_v15 = vadd.f32 %v2386_v51, %v1226_v9  ;;  %v1228_v24 = vadd.f32 %v1227_v11, %v954_v47  ;;  %v1340_v33 = vmax.f32 %v1308_v6, 0.0  ;;  %v2437_v55 = vpop.f32.mrf.mxu1 }
 0x1db   : > { %v1229_v29 = vpop.f32.mrf.mxu0 }
 0x1dc   : > { %1465 = vst [vmem:[%s2514_s5 + $0x8] sm:$0xff] %v1668_v13  ;;  %v1341_v34 = vmax.f32 %v1309_v15, 0.0  ;;  %v1310_v36 = vadd.f32 %v2384_v12, %v1228_v24  ;;  %v1230_v37 = vadd.f32 %v1229_v29, %v956_v48 }
 0x1dd   : > { %v1233_v38 = vpop.f32.mrf.mxu0 }
 0x1de   : > { %v1669_v39 = vpack.c.bf16 %v1341_v34, %v1340_v33  ;;  %v1311_v40 = vadd.f32 %v2386_v51, %v1230_v37  ;;  %v1234_v42 = vadd.f32 %v1233_v38, %v960_v49  ;;  %v1342_v45 = vmax.f32 %v1310_v36, 0.0 }
 0x1df   : > { %v1235_v43 = vpop.f32.mrf.mxu0 }
 0x1e0   : > { %1466 = vst [vmem:[%s2514_s5 + $0x10] sm:$0xff] %v1669_v39  ;;  %v1343_v46 = vmax.f32 %v1311_v40, 0.0  ;;  %v1312_v47 = vadd.f32 %v2384_v12, %v1234_v42  ;;  %v1236_v62 = vadd.f32 %v1235_v43, %v2361_v52 }
 0x1e1   : > { %v1237_v3 = vpop.f32.mrf.mxu0 }
 0x1e2   : > { %v1670_v48 = vpack.c.bf16 %v1343_v46, %v1342_v45  ;;  %v1313_v5 = vadd.f32 %v2386_v51, %v1236_v62  ;;  %v1238_v7 = vadd.f32 %v1237_v3, %v2363_v53  ;;  %v1344_v18 = vmax.f32 %v1312_v47, 0.0 }
 0x1e3   : > { %v1239_v49 = vpop.f32.mrf.mxu0 }
 0x1e4   : > { %1467 = vst [vmem:[%s2514_s5 + $0x18] sm:$0xff] %v1670_v48  ;;  %v1345_v14 = vmax.f32 %v1313_v5, 0.0  ;;  %v1314_v41 = vadd.f32 %v2384_v12, %v1238_v7  ;;  %v1240_v50 = vadd.f32 %v1239_v49, %v2365_v54 }
 0x1e5   : > { %v1243_v52 = vpop.f32.mrf.mxu0 }
 0x1e6   : > { %v1671_v19 = vpack.c.bf16 %v1345_v14, %v1344_v18  ;;  %v1315_v21 = vadd.f32 %v2386_v51, %v1240_v50  ;;  %v1244_v22 = vadd.f32 %v1243_v52, %v2367_v56  ;;  %v1346_v25 = vmax.f32 %v1314_v41, 0.0 }
 0x1e7   : > { %v1245_v53 = vpop.f32.mrf.mxu0 }
 0x1e8   : > { %1468 = vst [vmem:[%s2514_s5 + $0x20] sm:$0xff] %v1671_v19  ;;  %v1347_v27 = vmax.f32 %v1315_v21, 0.0  ;;  %v1316_v28 = vadd.f32 %v2384_v12, %v1244_v22  ;;  %v1246_v20 = vadd.f32 %v1245_v53, %v2369_v57 }
 0x1e9   : > { %v1247_v54 = vpop.f32.mrf.mxu0 }
 0x1ea   : > { %v1672_v30 = vpack.c.bf16 %v1347_v27, %v1346_v25  ;;  %v1317_v35 = vadd.f32 %v2386_v51, %v1246_v20  ;;  %v1248_v16 = vadd.f32 %v1247_v54, %v2371_v59  ;;  %v1348_v58 = vmax.f32 %v1316_v28, 0.0  ;;  %v2446_v59 = vpop.f32.mrf.mxu1 }
 0x1eb   : > { %v1249_v56 = vpop.f32.mrf.mxu0 }
 0x1ec   : > { %1469 = vst [vmem:[%s2514_s5 + $0x28] sm:$0xff] %v1672_v30  ;;  %v1349_v63 = vmax.f32 %v1317_v35, 0.0  ;;  %v1318_v0 = vadd.f32 %v2384_v12, %v1248_v16  ;;  %v1250_v2 = vadd.f32 %v1249_v56, %v2373_v60 }
 0x1ed   : > { %v1253_v57 = vpop.f32.mrf.mxu0 }
 0x1ee   : > { %v1673_v6 = vpack.c.bf16 %v1349_v63, %v1348_v58  ;;  %v1319_v9 = vadd.f32 %v2386_v51, %v1250_v2  ;;  %v1254_v11 = vadd.f32 %v1253_v57, %v2375_v61  ;;  %v1350_v15 = vmax.f32 %v1318_v0, 0.0  ;;  %v1012_v61 = vpop.f32.mrf.mxu1 }
 0x1ef   : > { %v1255_v13 = vpop.f32.mrf.mxu0 }
 0x1f0   : > { %1470 = vst [vmem:[%s2514_s5 + $0x30] sm:$0xff] %v1673_v6  ;;  %v1351_v24 = vmax.f32 %v1319_v9, 0.0  ;;  %v1320_v29 = vadd.f32 %v2384_v12, %v1254_v11  ;;  %v1256_v33 = vadd.f32 %v1255_v13, %v2377_v1  ;;  %v1014_v62 = vpop.f32.mrf.mxu1 }
 0x1f1   : > { %v1257_v60 = vpop.f32.mrf.mxu0 }
 0x1f2   : > { %v1674_v34 = vpack.c.bf16 %v1351_v24, %v1350_v15  ;;  %v1321_v36 = vadd.f32 %v2386_v51, %v1256_v33  ;;  %v1258_v37 = vadd.f32 %v1257_v60, %v2379_v4  ;;  %v1352_v39 = vmax.f32 %v1320_v29, 0.0  ;;  %v1016_v41 = vpop.f32.mrf.mxu1 }
 0x1f3   : > { %v1259_v38 = vpop.f32.mrf.mxu0 }
 0x1f4   : > { %1471 = vst [vmem:[%s2514_s5 + $0x38] sm:$0xff] %v1674_v34  ;;  %v1353_v40 = vmax.f32 %v1321_v36, 0.0  ;;  %v1322_v42 = vadd.f32 %v2384_v12, %v1258_v37  ;;  %v1260_v43 = vadd.f32 %v1259_v38, %v2382_v10 }
 0x1f5   : > { %v1263_v45 = vpop.f32.mrf.mxu0 }
 0x1f6   : > { %v1675_v1 = vpack.c.bf16 %v1353_v40, %v1352_v39  ;;  %v1323_v46 = vadd.f32 %v2386_v51, %v1260_v43  ;;  %v1264_v47 = vadd.f32 %v1263_v45, %v2388_v32  ;;  %v1354_v3 = vmax.f32 %v1322_v42, 0.0 }
 0x1f7   : > { %v1265_v4 = vpop.f32.mrf.mxu0 }
 0x1f8   : > { %1472 = vst [vmem:[%s2514_s5 + $0x40] sm:$0xff] %v1675_v1  ;;  %v1355_v48 = vmax.f32 %v1323_v46, 0.0  ;;  %v1324_v5 = vadd.f32 %v2384_v12, %v1264_v47  ;;  %v1266_v7 = vadd.f32 %v1265_v4, %v2392_v26 }
 0x1f9   : > { %v1267_v49 = vpop.f32.mrf.mxu0 }
 0x1fa   : > { %v1676_v10 = vpack.c.bf16 %v1355_v48, %v1354_v3  ;;  %v1325_v18 = vadd.f32 %v2386_v51, %v1266_v7  ;;  %v1268_v14 = vadd.f32 %v1267_v49, %v2396_v17  ;;  %v1356_v50 = vmax.f32 %v1324_v5, 0.0 }
 0x1fb   : > { %v1269_v32 = vpop.f32.mrf.mxu0 }
 0x1fc   : > { %1473 = vst [vmem:[%s2514_s5 + $0x48] sm:$0xff] %v1676_v10  ;;  %v1357_v52 = vmax.f32 %v1325_v18, 0.0  ;;  %v1326_v19 = vadd.f32 %v2384_v12, %v1268_v14  ;;  %v1270_v21 = vadd.f32 %v1269_v32, %v2403_v31 }
 0x1fd   : > { %v1273_v22 = vpop.f32.mrf.mxu1 }
 0x1fe   : > { %v1677_v26 = vpack.c.bf16 %v1357_v52, %v1356_v50  ;;  %v1327_v53 = vadd.f32 %v2386_v51, %v1270_v21  ;;  %v1274_v25 = vadd.f32 %v1273_v22, %v2410_v44  ;;  %v1358_v17 = vmax.f32 %v1326_v19, 0.0 }
 0x1ff   : > { %v1275_v27 = vpop.f32.mrf.mxu1 }
 0x200   : > { %1474 = vst [vmem:[%s2514_s5 + $0x50] sm:$0xff] %v1677_v26  ;;  %v1359_v28 = vmax.f32 %v1327_v53, 0.0  ;;  %v1328_v20 = vadd.f32 %v2384_v12, %v1274_v25  ;;  %v1276_v54 = vadd.f32 %v1275_v27, %v2419_v8 }
 0x201   : > { %v1277_v30 = vpop.f32.mrf.mxu1 }
 0x202   : > { %v1678_v35 = vpack.c.bf16 %v1359_v28, %v1358_v17  ;;  %v1329_v31 = vadd.f32 %v2386_v51, %v1276_v54  ;;  %v1278_v16 = vadd.f32 %v1277_v30, %v2428_v23  ;;  %v1360_v44 = vmax.f32 %v1328_v20, 0.0 }
 0x203   : > { %v1279_v56 = vpop.f32.mrf.mxu1 }
 0x204   : > { %1475 = vst [vmem:[%s2514_s5 + $0x58] sm:$0xff] %v1678_v35  ;;  %v1361_v58 = vmax.f32 %v1329_v31, 0.0  ;;  %v1330_v63 = vadd.f32 %v2384_v12, %v1278_v16  ;;  %v1280_v0 = vadd.f32 %v1279_v56, %v2437_v55 }
 0x205   : > { %v1283_v2 = vpop.f32.mrf.mxu1 }
 0x206   : > { %v1679_v57 = vpack.c.bf16 %v1361_v58, %v1360_v44  ;;  %v1331_v8 = vadd.f32 %v2386_v51, %v1280_v0  ;;  %v1284_v6 = vadd.f32 %v1283_v2, %v2446_v59  ;;  %v1362_v23 = vmax.f32 %v1330_v63, 0.0 }
 0x207   : > { %v1285_v9 = vpop.f32.mrf.mxu1 }
 0x208   : > { %1476 = vst [vmem:[%s2514_s5 + $0x60] sm:$0xff] %v1679_v57  ;;  %v1363_v11 = vmax.f32 %v1331_v8, 0.0  ;;  %v1332_v13 = vadd.f32 %v2384_v12, %v1284_v6  ;;  %v1286_v15 = vadd.f32 %v1285_v9, %v1012_v61 }
 0x209   : > { %v1287_v24 = vpop.f32.mrf.mxu1 }
 0x20a   : > { %v1680_v29 = vpack.c.bf16 %v1363_v11, %v1362_v23  ;;  %v1333_v55 = vadd.f32 %v2386_v51, %v1286_v15  ;;  %v1288_v33 = vadd.f32 %v1287_v24, %v1014_v62  ;;  %v1364_v59 = vmax.f32 %v1332_v13, 0.0 }
 0x20b   : > { %v1289_v60 = vpop.f32.mrf.mxu1 }
 0x20c   : > { %1477 = vst [vmem:[%s2514_s5 + $0x68] sm:$0xff] %v1680_v29  ;;  %v1365_v34 = vmax.f32 %v1333_v55, 0.0  ;;  %v1334_v36 = vadd.f32 %v2384_v12, %v1288_v33  ;;  %v1290_v37 = vadd.f32 %v1289_v60, %v1016_v41 }
 0x20e   : > { %v1681_v38 = vpack.c.bf16 %v1365_v34, %v1364_v59  ;;  %v1335_v39 = vadd.f32 %v2386_v51, %v1290_v37  ;;  %v1366_v61 = vmax.f32 %v1334_v36, 0.0 }
 0x210   : > { %1478 = vst [vmem:[%s2514_s5 + $0x70] sm:$0xff] %v1681_v38  ;;  %v1367_v40 = vmax.f32 %v1335_v39, 0.0 }
 0x212   : > { %v1682_v42 = vpack.c.bf16 %v1367_v40, %v1366_v61 }
 0x214   : > { %1479 = vst [vmem:[%s2514_s5 + $0x78] sm:$0xff] %v1682_v42 }
 0x215 PF: > { %s15_s18 = sadd.s32 1, %s1860_s18  }
 0x216   : > { %p12_p5 = scmp.ge.s32.totalorder %s15_s18, 5  }
 0x218   :  { %14 = sbr.rel (!%p12_p5) target bundleno = 1 (0x1), region = 74 }

</bundles_post_ra>
